<compile_context>
chip_gen: v7x
topology: tpu7x:2x2x1
jax: 0.10.0
libtpu: 0.0.40
codegen_flags: <defaults>
</compile_context>

<pallas_src>
import functools

import jax
import jax.numpy as jnp
from jax.experimental import pallas as pl
from jax.experimental.pallas import tpu as pltpu


def _cdiv(a, b):
    return -(-a // b)


def _round_up(x, m):
    return (x + m - 1) // m * m


def _bridge_feat_loss_kernel(f_s_ref, f_t_ref, f_m_ref, lam_ref, out_ref, *,
                             batch, tile_b):
    f_m = f_m_ref[...].astype(jnp.float32)
    f_s = f_s_ref[...].astype(jnp.float32)
    f_t = f_t_ref[...].astype(jnp.float32)
    lam = lam_ref[...].astype(jnp.float32)

    # Per-row squared distances (lane reduction), clamp, sqrt (EUP slot).
    d2s = jnp.sum((f_m - f_s) ** 2, axis=1, keepdims=True)   # (tile_b, 1)
    d2t = jnp.sum((f_m - f_t) ** 2, axis=1, keepdims=True)   # (tile_b, 1)
    ds = jnp.sqrt(jnp.maximum(d2s, 1e-12))
    dt = jnp.sqrt(jnp.maximum(d2t, 1e-12))

    # lam-weighted per-row bridge distance.
    w = lam[:, 0:1] * ds + lam[:, 1:2] * dt                  # (tile_b, 1)

    # Mask the ragged tail rows of the last block (their data is garbage from
    # the out-of-bounds read); jnp.where selects 0 so inf/NaN cannot leak in.
    start = pl.program_id(0) * tile_b
    rows = jax.lax.broadcasted_iota(jnp.int32, (tile_b, 1), 0)
    valid = (start + rows) < batch
    w = jnp.where(valid, w, 0.0)

    # One scalar partial per grid step, pre-scaled by 1/B (B is static).
    partial = jnp.sum(w, axis=0, keepdims=True) * (1.0 / batch)   # (1, 1)
    out_ref[...] = jnp.broadcast_to(partial[None], out_ref.shape)


def _pick_tile_b(B, D, feat_itemsize):
    """Bytes-based batch tile: fits a conservative VMEM budget, >= ~4 steps."""
    # Sublane packing multiple: 8 for 32-bit, 16 for bf16, 32 for 8-bit.
    sublane = max(8, 32 // max(1, feat_itemsize))
    # Explicit-buffer budget; safe on v7x (64 MiB VMEM per TensorCore) even
    # with Mosaic internal scratch, and costs nothing on v5e/v6e (streaming
    # kernels already hit ~85% of HBM roofline at 512-1024-row f32 tiles).
    budget = 24 * 1024 * 1024
    # Per batch-row VMEM: 3 double-buffered native-dtype input rows, plus one
    # f32 temp row per input (upcast / elementwise intermediates), plus the
    # lane-padded (tile_b, 2) lam block (2 buffers).
    per_row = 3 * D * (2 * feat_itemsize + 4) + 2 * 128 * 4
    tile_b = max(sublane, (budget // per_row) // sublane * sublane)
    # Minimum-steps rule: prefer >= 4 grid steps (when B allows) so both v7x
    # TensorCores get work on the "parallel" axis and the pipeline has
    # steady-state double buffering; per-step overhead is only ~0.35us.
    min_steps = 4
    steps_cap = max(sublane, _round_up(_cdiv(B, min_steps), sublane))
    tile_b = min(tile_b, steps_cap, _round_up(B, sublane))
    buffered = per_row * tile_b + 2 * 8 * 128 * 4
    vmem_limit = int(min(40 << 20, max(32 << 20, buffered + (8 << 20))))
    return int(tile_b), vmem_limit


def _reference(f_s, f_t, f_mixed, lam):
    d2s = jnp.sum((f_mixed - f_s) ** 2, axis=1, keepdims=True)
    d2t = jnp.sum((f_mixed - f_t) ** 2, axis=1, keepdims=True)
    ds = jnp.sqrt(jnp.clip(d2s, 1e-12, None))
    dt = jnp.sqrt(jnp.clip(d2t, 1e-12, None))
    dist = jnp.concatenate([ds, dt], axis=1)
    lam_dist = jnp.sum(lam * dist, axis=1, keepdims=True)
    return jnp.mean(lam_dist)


def bridge_feat_loss(f_s, f_t, f_mixed, lam, *, tile_b=None,
                     small_input_fallback=True):
    B, D = f_s.shape
    assert f_t.shape == (B, D) and f_mixed.shape == (B, D)
    assert lam.shape == (B, 2)

    feat_itemsize = jnp.dtype(f_s.dtype).itemsize
    lam_itemsize = jnp.dtype(lam.dtype).itemsize

    # Tiny inputs: the fixed pallas_call cost exceeds the fused XLA version.
    if small_input_fallback and 3 * B * D * feat_itemsize < (1 << 20):
        return _reference(f_s, f_t, f_mixed, lam)

    auto_tile, vmem_limit = _pick_tile_b(B, D, feat_itemsize)
    if tile_b is None:
        tile_b = auto_tile
    grid_n = _cdiv(B, tile_b)

    feat_spec = pl.BlockSpec((tile_b, D), lambda i: (i, 0))
    lam_spec = pl.BlockSpec((tile_b, 2), lambda i: (i, 0))
    # Lane-dense, fully tiled (8, 128) partial-sum block per grid step.
    out_spec = pl.BlockSpec((1, 8, 128), lambda i: (i, 0, 0))

    cost = pl.CostEstimate(
        flops=int(7 * B * D + 4 * B),
        transcendentals=int(2 * B),
        bytes_accessed=int(3 * B * D * feat_itemsize
                           + B * 2 * lam_itemsize
                           + grid_n * 8 * 128 * 4),
    )

    partials = pl.pallas_call(
        functools.partial(_bridge_feat_loss_kernel, batch=B, tile_b=tile_b),
        out_shape=jax.ShapeDtypeStruct((grid_n, 8, 128), jnp.float32),
        grid_spec=pltpu.PrefetchScalarGridSpec(
            num_scalar_prefetch=0,
            grid=(grid_n,),
            in_specs=[feat_spec, feat_spec, feat_spec, lam_spec],
            out_specs=out_spec,
        ),
        compiler_params=pltpu.CompilerParams(
            dimension_semantics=("parallel",),
            vmem_limit_bytes=vmem_limit,
        ),
        cost_estimate=cost,
    )(f_s, f_t, f_mixed, lam)

    # Tiny final reduction over grid_n pre-scaled partials.
    return jnp.sum(partials[:, 0, 0])


if __name__ == "__main__":
    key = jax.random.PRNGKey(0)
    k1, k2, k3, k4 = jax.random.split(key, 4)

    B, D = 16, 32
    f_s = jax.random.normal(k1, (B, D), dtype=jnp.float32)
    f_t = jax.random.normal(k2, (B, D), dtype=jnp.float32)
    # Deterministic per-row mixing coefficient, like IDM's bridge features.
    mix = jax.random.uniform(k4, (B, 1), dtype=jnp.float32)
    f_mixed = mix * f_s + (1.0 - mix) * f_t
    lam = jnp.concatenate([mix, 1.0 - mix], axis=1)  # (B, 2)

    # Force the Pallas path (inputs are below the small-input fallback size).
    loss = bridge_feat_loss(f_s, f_t, f_mixed, lam, small_input_fallback=False)
    jax.block_until_ready(loss)
    ref = _reference(f_s, f_t, f_mixed, lam)
    assert jnp.allclose(loss, ref, rtol=1e-5, atol=1e-5), (loss, ref)

    # Batch that does not divide the tile: exercises the ragged-tail masking.
    B2 = 13
    loss2 = bridge_feat_loss(f_s[:B2], f_t[:B2], f_mixed[:B2], lam[:B2],
                             small_input_fallback=False)
    jax.block_until_ready(loss2)
    ref2 = _reference(f_s[:B2], f_t[:B2], f_mixed[:B2], lam[:B2])
    assert jnp.allclose(loss2, ref2, rtol=1e-5, atol=1e-5), (loss2, ref2)

    # Default path (small-input XLA fallback) for coverage.
    loss3 = bridge_feat_loss(f_s, f_t, f_mixed, lam)
    jax.block_until_ready(loss3)
    assert jnp.allclose(loss3, ref, rtol=1e-5, atol=1e-5), (loss3, ref)

    print("KERNEL_OK")
</pallas_src>

<mosaic_0001>
module attributes {stable_mosaic.version = 11 : i64} {
  func.func @_bridge_feat_loss_kernel(%arg0: i32, %arg1: memref<8x32xf32, #tpu.memory_space<vmem>>, %arg2: memref<8x32xf32, #tpu.memory_space<vmem>>, %arg3: memref<8x32xf32, #tpu.memory_space<vmem>>, %arg4: memref<8x2xf32, #tpu.memory_space<vmem>>, %arg5: memref<1x8x128xf32, #tpu.memory_space<vmem>>) attributes {dimension_semantics = [#tpu.dimension_semantics<parallel>], iteration_bounds = array<i64: 2>, scalar_prefetch = 0 : i64, scratch_operands = 0 : i64, tpu.core_type = #tpu.core_type<tc>, window_params = [{transform_indices = @transform_0, window_bounds = array<i64: 8, 32>}, {transform_indices = @transform_1, window_bounds = array<i64: 8, 32>}, {transform_indices = @transform_2, window_bounds = array<i64: 8, 32>}, {transform_indices = @transform_3, window_bounds = array<i64: 8, 2>}, {transform_indices = @transform_4, window_bounds = array<i64: 1, 8, 128>}]} {
    %c0 = arith.constant 0 : index
    %c0_0 = arith.constant 0 : index
    %0 = vector.load %arg3[%c0, %c0_0] : memref<8x32xf32, #tpu.memory_space<vmem>>, vector<8x32xf32>
    %c0_1 = arith.constant 0 : index
    %c0_2 = arith.constant 0 : index
    %1 = vector.load %arg1[%c0_1, %c0_2] : memref<8x32xf32, #tpu.memory_space<vmem>>, vector<8x32xf32>
    %c0_3 = arith.constant 0 : index
    %c0_4 = arith.constant 0 : index
    %2 = vector.load %arg2[%c0_3, %c0_4] : memref<8x32xf32, #tpu.memory_space<vmem>>, vector<8x32xf32>
    %c0_5 = arith.constant 0 : index
    %c0_6 = arith.constant 0 : index
    %3 = vector.load %arg4[%c0_5, %c0_6] : memref<8x2xf32, #tpu.memory_space<vmem>>, vector<8x2xf32>
    %4 = arith.subf %0, %1 : vector<8x32xf32>
    %5 = arith.mulf %4, %4 : vector<8x32xf32>
    %cst = arith.constant dense<0.000000e+00> : vector<8xf32>
    %6 = vector.multi_reduction <add>, %5, %cst [1] : vector<8x32xf32> to vector<8xf32>
    %7 = vector.shape_cast %6 : vector<8xf32> to vector<8x1xf32>
    %8 = arith.subf %0, %2 : vector<8x32xf32>
    %9 = arith.mulf %8, %8 : vector<8x32xf32>
    %cst_7 = arith.constant dense<0.000000e+00> : vector<8xf32>
    %10 = vector.multi_reduction <add>, %9, %cst_7 [1] : vector<8x32xf32> to vector<8xf32>
    %11 = vector.shape_cast %10 : vector<8xf32> to vector<8x1xf32>
    %cst_8 = arith.constant 9.99999996E-13 : f32
    %12 = vector.broadcast %cst_8 : f32 to vector<8x1xf32>
    %13 = arith.maximumf %7, %12 : vector<8x1xf32>
    %14 = math.sqrt %13 : vector<8x1xf32>
    %cst_9 = arith.constant 9.99999996E-13 : f32
    %15 = vector.broadcast %cst_9 : f32 to vector<8x1xf32>
    %16 = arith.maximumf %11, %15 : vector<8x1xf32>
    %17 = math.sqrt %16 : vector<8x1xf32>
    %18 = vector.extract_strided_slice %3 {offsets = [0, 0], sizes = [8, 1], strides = [1, 1]} : vector<8x2xf32> to vector<8x1xf32>
    %19 = arith.mulf %18, %14 : vector<8x1xf32>
    %20 = vector.extract_strided_slice %3 {offsets = [0, 1], sizes = [8, 1], strides = [1, 1]} : vector<8x2xf32> to vector<8x1xf32>
    %21 = arith.mulf %20, %17 : vector<8x1xf32>
    %22 = arith.addf %19, %21 : vector<8x1xf32>
    %c8_i32 = arith.constant 8 : i32
    %23 = arith.muli %arg0, %c8_i32 : i32
    %24 = tpu.iota {dimensions = array<i32: 0>} : vector<8x1xi32>
    %25 = vector.broadcast %23 : i32 to vector<8x1xi32>
    %26 = arith.addi %25, %24 : vector<8x1xi32>
    %c16_i32 = arith.constant 16 : i32
    %27 = vector.broadcast %c16_i32 : i32 to vector<8x1xi32>
    %28 = arith.cmpi slt, %26, %27 : vector<8x1xi32>
    %cst_10 = arith.constant 0.000000e+00 : f32
    %29 = vector.broadcast %cst_10 : f32 to vector<8x1xf32>
    %30 = arith.select %28, %22, %29 : vector<8x1xi1>, vector<8x1xf32>
    %cst_11 = arith.constant dense<0.000000e+00> : vector<1xf32>
    %31 = vector.multi_reduction <add>, %30, %cst_11 [0] : vector<8x1xf32> to vector<1xf32>
    %32 = vector.shape_cast %31 : vector<1xf32> to vector<1x1xf32>
    %cst_12 = arith.constant 6.250000e-02 : f32
    %33 = vector.broadcast %cst_12 : f32 to vector<1x1xf32>
    %34 = arith.mulf %32, %33 : vector<1x1xf32>
    %35 = vector.shape_cast %34 : vector<1x1xf32> to vector<1x1x1xf32>
    %36 = vector.shape_cast %35 : vector<1x1x1xf32> to vector<1x1x1xf32>
    %37 = vector.broadcast %36 : vector<1x1x1xf32> to vector<1x8x128xf32>
    %c0_13 = arith.constant 0 : index
    %c0_14 = arith.constant 0 : index
    %c0_15 = arith.constant 0 : index
    %38 = vector.load %arg5[%c0_13, %c0_14, %c0_15] : memref<1x8x128xf32, #tpu.memory_space<vmem>>, vector<1x8x128xf32>
    tpu.vector_store %arg5[%c0_13, %c0_14, %c0_15], %37 {strides = array<i32>} : memref<1x8x128xf32, #tpu.memory_space<vmem>>, vector<1x8x128xf32>,
    return
  }
  func.func @transform_0(%arg0: i32) -> (i32, i32) {
    %c0_i32 = arith.constant 0 : i32
    %c0_i32_0 = arith.constant 0 : i32
    return %arg0, %c0_i32 : i32, i32
  }
  func.func @transform_1(%arg0: i32) -> (i32, i32) {
    %c0_i32 = arith.constant 0 : i32
    %c0_i32_0 = arith.constant 0 : i32
    return %arg0, %c0_i32 : i32, i32
  }
  func.func @transform_2(%arg0: i32) -> (i32, i32) {
    %c0_i32 = arith.constant 0 : i32
    %c0_i32_0 = arith.constant 0 : i32
    return %arg0, %c0_i32 : i32, i32
  }
  func.func @transform_3(%arg0: i32) -> (i32, i32) {
    %c0_i32 = arith.constant 0 : i32
    %c0_i32_0 = arith.constant 0 : i32
    return %arg0, %c0_i32 : i32, i32
  }
  func.func @transform_4(%arg0: i32) -> (i32, i32, i32) {
    %c0_i32 = arith.constant 0 : i32
    %c0_i32_0 = arith.constant 0 : i32
    %c0_i32_1 = arith.constant 0 : i32
    return %arg0, %c0_i32, %c0_i32_0 : i32, i32, i32
  }
}

</mosaic_0001>

<bundles_post_ra>
// kernel: tpu_custom_call.1
= control target key start
LH: loop header
LB: loop body
LE: loop exit
PB: predicated region body
PF: predicated region fallthrough
CT: control target
= control target key end

     0   :  { %9 = vsyncpa [#allocation3], 0  ;;  %s937_s0 = inlined_call_operand.vmem [shape: f32[16,32], index: 0, kind: input, shape index: {}]   ;;  %s938_s1 = inlined_call_operand.hbm [shape: f32[16,32], index: 1, kind: input, shape index: {}]   ;;  %s939_s2 = inlined_call_operand.hbm [shape: f32[16,32], index: 2, kind: input, shape index: {}]   ;;  %s940_s3 = inlined_call_operand.vmem [shape: f32[16,2], index: 3, kind: input, shape index: {}]   ;;  %s941_s4 = inlined_call_operand.hbm [shape: f32[2,8,128], index: 4, kind: output, shape index: {}]  }
   0x1   :  { %11 = vsyncpa [#allocation3 + $0x1], 0 }
   0x2   :  { %12 = vsyncpa [#allocation6], 0 }
   0x3   :  { %14 = vsyncpa [#allocation6 + $0x1], 0 }
   0x4   :  { %15 = vsyncpa [#allocation4], 0 }
   0x5   :  { %17 = vsyncpa [#allocation4 + $0x1], 0  ;;  %s714_s15 = smov 0   ;;  %s716_s16 = smov 0  }
   0x6   :  { %s718_s17 = smov 0   ;;  %s720_s18 = smov 0  }
   0x7 LB: > { %s735_s19 = sadd.s32 4294967295, %s682_s18   ;;  %s475_s20 = sadd.s32 4294967294, %s682_s18   ;;  %s682_s18 = sphi %s720_s18, %s960_s18   ;;  %s678_s17 = sphi %s718_s17, %s959_s17   ;;  %s674_s16 = sphi %s716_s16, %s958_s16   ;;  %s670_s15 = sphi %s714_s15, %s957_s15  }
   0x8   : > { %s739_s21 = sadd.s32 1, %s682_s18   ;;  %s56_s22 = sadd.s32 1, %s678_s17 }
   0x9   : > { %s53_s23 = ssub.s32 %s682_s18, %s739_s21  ;;  %p63_p0 = scmp.ne.s32.totalorder %s678_s17, %s674_s16 }
   0xa   : > { %p54_p1 = scmp.eq.s32.totalorder %s53_s23, 0  ;;  %p64_p2 = scmp.eq.s32.totalorder %s682_s18, 0 }
   0xb   : > { %p69_p3 = scmp.ne.s32.totalorder %s674_s16, %s670_s15  ;;  %p70_p4 = scmp.eq.s32.totalorder %s735_s19, 0 }
   0xc   : > { %s751_s24 = scalar_select %p54_p1, %s678_s17, %s56_s22  }
   0xd   : > { %p753_p5 = por %p64_p2, %p63_p0  ;;  %p757_p6 = por %p70_p4, %p69_p3 }
   0xe   : > { %p145_p7 = scmp.eq.s32.totalorder %s735_s19, 1  ;;  %p151_p8 = scmp.eq.s32.totalorder %s475_s20, 1 }
   0xf   : > { %s945_s26 = scalar_select %p757_p6, 1, 0 }
  0x10   : > { %p510_p10 = scmp.lt.s32.totalorder %s682_s18, 2  ;;  %p764_p11 = por %p145_p7, %p63_p0 }
  0x11   : > { %p768_p12 = por %p151_p8, %p69_p3  ;;  %s773_s29 = sand.u32 1, %s678_s17  }
  0x12   : > { %s946_s27 = scalar_select %p764_p11, 1, 0 }
  0x13   : > { %s947_s28 = scalar_select %p768_p12, 1, 0 }
  0x14   : > { %s479_s30 = sshll.u32 %s682_s18, 7  ;;  %s478_s5 = sshll.u32 %s773_s29, 3 }
  0x15   : > { %s782_s8 = scalar_lea.hbm %s938_s1, %s479_s30  ;;  %s182_s9 = scalar_lea.vmem [#allocation2], %s478_s5 }
  0x16   : > { %s189_s10 = sshll.u32 %s182_s9, 4  ;;  %p788_p13 = pnand %p510_p10, %p753_p5  ;;  %s792_s10 = int_to_ptr.vmem [resolvable:$true] %s189_s10 }
  0x17   : > { %s179_s12 = scalar_lea.sflag [#allocation3], %s773_s29  ;;  %s552_s13 = scalar_lea.hbm %s782_s8, 128 }
  0x18   : > { %p553_p2 = scmp.ne.s32.totalorder %s782_s8, %s552_s13  ;;  %p554_p3 = pneg %p788_p13 }
  0x19   : > { %s557_s22 = scalar_lea.hbm %s938_s1, 256  ;;  %p558_p5 = scmp.lt.u32.totalorder %s782_s8, %s938_s1 }
  0x1a   : > { %p555_p4 = pnand %p554_p3, %p553_p2  ;;  %p559_p8 = scmp.lt.u32.totalorder %s557_s22, %s552_s13 }
  0x1b   : > { %p561_p9 = scmp.lt.u32.totalorder %s552_s13, %s782_s8 }
  0x1c   : > { %p556_p7 = pneg %p555_p4  ;;  %p560_p10 = por %p559_p8, %p558_p5 }
  0x1e   : > { %p562_p0 = por %p561_p9, %p560_p10 }
  0x20   : > { %p563_p1 = pnand %p562_p0, %p556_p7 }
  0x22   : > { %566 = shalt.err (!%p563_p1)
}
  0x23   : > { %s567_s6 = scalar_lea.vmem %s792_s10, 128  ;;  %s684_s7 = smov [#allocation2]  }
  0x24   : > { %p568_p2 = scmp.ne.s32.totalorder %s792_s10, %s567_s6  ;;  %s572_s9 = sshll.u32 %s684_s7, 4  ;;  %s573_s9 = int_to_ptr.vmem [resolvable:$false] %s572_s9 }
  0x25   : > { %s574_s14 = scalar_lea.vmem %s573_s9, 256  ;;  %p575_p11 = scmp.lt.s32.totalorder %s792_s10, %s573_s9 }
  0x26   : > { %p570_p4 = pnand %p568_p2, %p554_p3  ;;  %p576_p5 = scmp.lt.s32.totalorder %s574_s14, %s567_s6 }
  0x28   : > { %p571_p12 = pneg %p570_p4  ;;  %p577_p8 = por %p576_p5, %p575_p11 }
  0x2a   : > { %p578_p9 = pnand %p577_p8, %p571_p12 }
  0x2c   : > { %581 = shalt.err (!%p578_p9)
}
  0x2d   : > { %502 = dma.hbm_to_vmem [thread:$0]  (!%p788_p13), %s782_s8, 128, %s792_s10, %s179_s12  }
  0x2e   : > { %p949_p0 = scmp.lt.s32.totalorder %s682_s18, 3  ;;  %p950_p1 = scmp.ge.s32.totalorder %s682_s18, 1 }
  0x2f   : > { %s835_s23 = scalar_lea.hbm %s939_s2, %s479_s30  ;;  %s200_s25 = scalar_lea.vmem [#allocation5], %s478_s5 }
  0x30   : > { %p826_p7 = pnand %p950_p1, %p949_p0  ;;  %s207_s6 = sshll.u32 %s200_s25, 4  ;;  %s208_s6 = int_to_ptr.vmem [resolvable:$true] %s207_s6 }
  0x31   : > { %s197_s8 = scalar_lea.sflag [#allocation6], %s773_s29  ;;  %s582_s10 = scalar_lea.hbm %s835_s23, 128 }
  0x32   : > { %s951_s13 = scalar_select %p826_p7, 1, 0 }
  0x33   : > { %p583_p11 = scmp.ne.s32.totalorder %s835_s23, %s582_s10  ;;  %s587_s30 = scalar_lea.hbm %s939_s2, 256 }
  0x34   : > { %p588_p2 = scmp.lt.u32.totalorder %s835_s23, %s939_s2  ;;  %p589_p4 = scmp.lt.u32.totalorder %s587_s30, %s582_s10 }
  0x35   : > { %p585_p12 = pnand %p583_p11, %p554_p3  ;;  %p591_p8 = scmp.lt.u32.totalorder %s582_s10, %s835_s23 }
  0x36   : > { %p590_p5 = por %p589_p4, %p588_p2 }
  0x37   : > { %p586_p10 = pneg %p585_p12 }
  0x38   : > { %p592_p9 = por %p591_p8, %p590_p5 }
  0x3a   : > { %p593_p0 = pnand %p592_p9, %p586_p10 }
  0x3c   : > { %596 = shalt.err (!%p593_p0)
}
  0x3d   : > { %s597_s29 = scalar_lea.vmem %s208_s6, 128  ;;  %s685_s5 = smov [#allocation5]  }
  0x3e   : > { %p598_p1 = scmp.ne.s32.totalorder %s208_s6, %s597_s29  ;;  %s602_s20 = sshll.u32 %s685_s5, 4  ;;  %s603_s20 = int_to_ptr.vmem [resolvable:$false] %s602_s20 }
  0x3f   : > { %s604_s22 = scalar_lea.vmem %s603_s20, 256  ;;  %p605_p6 = scmp.lt.s32.totalorder %s208_s6, %s603_s20 }
  0x40   : > { %p600_p11 = pnand %p598_p1, %p554_p3  ;;  %p606_p7 = scmp.lt.s32.totalorder %s604_s22, %s597_s29 }
  0x42   : > { %p601_p12 = pneg %p600_p11  ;;  %p607_p2 = por %p606_p7, %p605_p6 }
  0x44   : > { %p608_p4 = pnand %p607_p2, %p601_p12 }
  0x46   : > { %611 = shalt.err (!%p608_p4)
}
  0x47   : > { %505 = dma.hbm_to_vmem [thread:$0]  (!%p788_p13), %s835_s23, 128, %s208_s6, %s197_s8  }
  0x48   : > { %p952_p10 = scmp.ne.s32.totalorder %s951_s13, 0 }
  0x49   : > { %s862_s25 = sand.u32 (!%p952_p10), 1, %s674_s16   ;;  %p953_p6 = scmp.ne.s32.totalorder (!%p952_p10), %s945_s26, 0 }
  0x4a   : > { %223 = sbr.rel (%p952_p10) target bundleno = 526 (0x20e), region = 36  ;;  %s865_s10 = sshll.u32 (!%p952_p10), %s862_s25, 3 }
  0x4b   : > { %s226_s12 = scalar_lea.sflag (!%p952_p10), [#allocation3], %s862_s25  ;;  %s229_s7 = scalar_lea.vmem (!%p952_p10), [#allocation2], %s865_s10 }
  0x51   : > { %657 = dma.done.wait (%p953_p6), %s226_s12, 128  }
  0x52   : > { %659 = vsyncadd (%p953_p6), %s226_s12, 4294967168  ;;  %s235_s11 = scalar_lea.sflag [#allocation6], %s862_s25  ;;  %s238_s13 = scalar_lea.vmem [#allocation5], %s865_s10 }
  0x53   : > { %661 = dma.done.wait (%p953_p6), %s235_s11, 128  }
  0x54   : > { %663 = vsyncadd (%p953_p6), %s235_s11, 4294967168  ;;  %p276_p13 = scmp.lt.s32.totalorder %s735_s19, 1  ;;  %v284_v0 = vld [vmem:[%s238_s13] sm:$0xff]  ;;  %v286_v1 = vld [vmem:[%s229_s7] sm:$0xff]  ;;  %vm290_vm0 = vcmask 261120   ;;  %v686_v16 = vmov 0   ;;  %v323_v22 = vlaneseq }
  0x55   : > { %v294_v3 = vsub.f32 %v284_v0, %v286_v1  ;;  %546 = vset.pattern.permute.xlu1 %v686_v16  ;;  %547 = vset.pattern.permute.xlu0 %v686_v16  ;;  %s687_s5 = smov 127   ;;  %s488_s20 = sshll.u32 %s735_s19, 3  ;;  %vm329_vm6 = vcmask 7168  }
  0x56   : > { %s277_s23 = scalar_select %p276_p13, %s735_s19, 1  ;;  %v324_v24 = vshrl.u32 %v323_v22, 7  ;;  %v325_v26 = vstv %s488_s20 }
  0x57   : > { %v295_v5 = vmul.f32 %v294_v3, %v294_v3  ;;  %s275_s22 = scalar_lea.vmem [#allocation7], %s865_s10  ;;  %s490_s7 = sshll.u32 %s735_s19, 7 }
  0x58   : > { %s486_s6 = sshll.u32 %s277_s23, 3  ;;  %v326_v28 = vadd.s32 %v325_v26, %v324_v24  ;;  %s358_s12 = sshll.u32 %s275_s22, 4  ;;  %s890_s12 = int_to_ptr.vmem [resolvable:$true] %s358_s12 }
  0x59   : > { %s279_s9 = scalar_lea.vmem %s937_s0, %s486_s6  ;;  %v296_v7 = vsel %vm290_vm0, %v295_v5, 0.0  ;;  %s283_s29 = scalar_lea.vmem %s940_s3, %s486_s6 }
  0x5a   : > { %v285_v2 = vld [vmem:[%s279_s9] sm:$0xff]  ;;  %297 = vadd.xlane.f32.xlu0 %v296_v7  ;;  %vm327_vm5 = vcmp.lt.s32.totalorder %v326_v28, 16  ;;  %s895_s23 = scalar_lea.hbm %s941_s4, %s490_s7  ;;  %s345_s6 = scalar_lea.sflag [#allocation4], %s862_s25 }
  0x5b   : > { %v288_v4 = vsub.f32 %v284_v0, %v285_v2  ;;  %v287_v13 = vld [vmem:[%s283_s29] sm:$0xff]  ;;  %s612_s8 = scalar_lea.vmem %s890_s12, 128  ;;  %p954_p7 = scmp.ne.s32.totalorder %s946_s27, 0 }
  0x5c   : > { %p613_p3 = scmp.ne.s32.totalorder %s890_s12, %s612_s8  ;;  %s688_s10 = smov [#allocation7]  }
  0x5d   : > { %v289_v6 = vmul.f32 %v288_v4, %v288_v4  ;;  %s616_s19 = sshll.u32 %s688_s10, 4  ;;  %s617_s19 = int_to_ptr.vmem [resolvable:$false] %s616_s19 }
  0x5e   : > { %p614_p5 = pnand %p613_p3, %p954_p7  ;;  %s618_s30 = scalar_lea.vmem %s617_s19, 256 }
  0x5f   : > { %v291_v8 = vsel %vm290_vm0, %v289_v6, 0.0  ;;  %p619_p9 = scmp.lt.s32.totalorder %s890_s12, %s617_s19  ;;  %p620_p0 = scmp.lt.s32.totalorder %s618_s30, %s612_s8 }
  0x60   : > { %292 = vadd.xlane.f32.xlu0 %v291_v8  ;;  %p615_p8 = pneg %p614_p5 }
  0x61   : > { %p621_p1 = por %p620_p0, %p619_p9 }
  0x63   : > { %p622_p11 = pnand %p621_p1, %p615_p8 }
  0xe7   : > { %v298_v9 = vpop.xlane.xlu0 %297 }
  0xe8   : > { %v307_v10 = vmax.f32 %v298_v9, 1e-12 }
  0xea   : > { %548 = vrsqrt.f32 %v307_v10  ;;  %vm310_vm1 = vcmp.eq.f32.partialorder %v307_v10, inf  ;;  %v313_v14 = vand.u32 2147483648, %v307_v10  ;;  %vm312_vm2 = vcmp.eq.f32.partialorder %v307_v10, 0.0 }
  0xed   : > { %v293_v19 = vpop.xlane.xlu0 %292 }
  0xee   : > { %v299_v20 = vmax.f32 %v293_v19, 1e-12 }
  0xf0   : > { %550 = vrsqrt.f32 %v299_v20  ;;  %vm302_vm3 = vcmp.eq.f32.partialorder %v299_v20, inf  ;;  %v305_v25 = vand.u32 2147483648, %v299_v20  ;;  %vm304_vm4 = vcmp.eq.f32.partialorder %v299_v20, 0.0 }
  0xf4   : > { %v549_v11 = vpop.eup %548 }
  0xf5   : > { %v309_v12 = vmul.f32 %v549_v11, %v307_v10 }
  0xf7   : > { %v311_v15 = vsel %vm310_vm1, %v307_v10, %v309_v12 }
  0xf8   : > { %v314_v17 = vsel %vm312_vm2, %v313_v14, %v311_v15 }
  0xf9   : > { %v316_v18 = vmul.f32 %v314_v17, %v287_v13 }
  0xfa   : > { %v551_v21 = vpop.eup %550 }
  0xfb   : > { %318 = vrot.lane.b32.xlu1 %v316_v18, %s687_s5  ;;  %v301_v23 = vmul.f32 %v551_v21, %v299_v20 }
  0xfd   : > { %v303_v27 = vsel %vm302_vm3, %v299_v20, %v301_v23 }
  0xfe   : > { %v306_v29 = vsel %vm304_vm4, %v305_v25, %v303_v27 }
  0xff   : > { %v315_v30 = vmul.f32 %v306_v29, %v287_v13 }
 0x16d   : > { %v319_v31 = vpop.permute.xlu1 %318 }
 0x16e   : > { %v321_v32 = vadd.f32 %v319_v31, %v315_v30 }
 0x170   : > { %v328_v33 = vsel %vm327_vm5, %v321_v32, 0.0 }
 0x171   : > { %v330_v34 = vsel %vm329_vm6, %v328_v33, 0.0 }
 0x172   : > { %v331_v35 = vrot.slane %v330_v34, 4 }
 0x174   : > { %v332_v36 = vadd.f32 %v331_v35, %v330_v34 }
 0x176   : > { %v333_v37 = vrot.slane %v332_v36, 2 }
 0x178   : > { %v334_v38 = vadd.f32 %v333_v37, %v332_v36 }
 0x17a   : > { %v335_v39 = vrot.slane %v334_v38, 1 }
 0x17c   : > { %v336_v40 = vadd.f32 %v335_v39, %v334_v38 }
 0x17e   : > { %v337_v41 = vmul.f32 0.0625, %v336_v40 }
 0x180   : > { %340 = vperm.xlu1 %546, %v337_v41  }
 0x1ff   : > { %v341_v42 = vpop.permute.xlu1 %340 }
 0x200   : > { %343 = vst [vmem:[%s275_s22] sm:$0xff] %v341_v42 }
 0x201   : > { %625 = shalt.err (!%p622_p11)
}
 0x202   : > { %s626_s25 = scalar_lea.hbm %s895_s23, 128  ;;  %s630_s14 = scalar_lea.hbm %s941_s4, 256 }
 0x203   : > { %p627_p12 = scmp.ne.s32.totalorder %s895_s23, %s626_s25  ;;  %p631_p10 = scmp.lt.u32.totalorder %s895_s23, %s941_s4 }
 0x204   : > { %p632_p6 = scmp.lt.u32.totalorder %s630_s14, %s626_s25  ;;  %p634_p3 = scmp.lt.u32.totalorder %s626_s25, %s895_s23 }
 0x205   : > { %p628_p2 = pnand %p627_p12, %p954_p7 }
 0x206   : > { %p633_p13 = por %p632_p6, %p631_p10 }
 0x207   : > { %p629_p4 = pneg %p628_p2 }
 0x208   : > { %p635_p5 = por %p634_p3, %p633_p13 }
 0x20a   : > { %p636_p8 = pnand %p635_p5, %p629_p4 }
 0x20c   : > { %639 = shalt.err (!%p636_p8)
}
 0x20d   : > { %497 = dma.vmem_to_hbm [thread:$0]  (%p954_p7), %s890_s12, 128, %s895_s23, %s345_s6  }
 0x20e PF: > { %s370_s20 = sand.u32 1, %s670_s15   ;;  %p955_p9 = scmp.ne.s32.totalorder %s947_s28, 0 }
 0x20f   : > { %p956_p0 = scmp.ge.s32.totalorder %s682_s18, 2  ;;  %s371_s22 = scalar_lea.sflag [#allocation4], %s370_s20 }
 0x211   : > { %p507_p1 = pnand %p956_p0, %p955_p9 }
 0x213   : > { %665 = dma.done.wait (!%p507_p1), %s371_s22, 128  }
 0x214   : > { %667 = vsyncadd (!%p507_p1), %s371_s22, 4294967168  ;;  %p20_p11 = scmp.ge.s32.totalorder %s739_s21, 4   ;;  %s957_s15 = smov %s674_s16 }
 0x215   : > { %s958_s16 = smov %s678_s17  ;;  %s959_s17 = smov %s751_s24 }
 0x216   : > { %s960_s18 = smov %s739_s21  ;;  %22 = sbr.rel (!%p20_p11) target bundleno = 7 (0x7), region = 100 }
 0x21d   :  { %376 = vsyncpa [#allocation3], 1 }
 0x21e   :  { %378 = vsyncpa [#allocation3 + $0x1], 1 }
 0x21f   :  { %379 = vsyncpa [#allocation6], 1 }
 0x220   :  { %381 = vsyncpa [#allocation6 + $0x1], 1 }
 0x221   :  { %382 = vsyncpa [#allocation4], 1 }
 0x222   :  { %384 = vsyncpa [#allocation4 + $0x1], 1 }

</bundles_post_ra>
